<compile_context>
chip_gen: v7x
topology: tpu7x:2x2x1
jax: 0.10.0
libtpu: 0.0.40
codegen_flags: <defaults>
</compile_context>

<pallas_src>
import jax
import jax.numpy as jnp
from jax.experimental import pallas as pl
from jax.experimental.pallas import tpu as pltpu

EPS = 1e-5
DOT_DTYPE = jnp.bfloat16            # MXU operand / big-intermediate dtype
VMEM_LIMIT_BYTES = 48 * 1024 * 1024  # above 16/32 MiB scoped defaults, < v7x 64 MiB

BRANCHES = (
    dict(name="conv_1x1",   k=1, dil=1,  pad=0),
    dict(name="conv_6x6",   k=3, dil=6,  pad=6),
    dict(name="conv_12x12", k=3, dil=12, pad=12),
    dict(name="conv_18x18", k=3, dil=18, pad=18),
    dict(name="conv_24x24", k=3, dil=24, pad=24),
    dict(name="image_pool", k=1, dil=1,  pad=0),   # AdaptiveAvgPool3d((None,)*3) == identity
    dict(name="conv_30x30", k=3, dil=30, pad=30),
)
NB = len(BRANCHES)


# ---------------------------------------------------------------------------
# pltpu.roll convention probe: we need rolled[..., i] == x[..., (i + off) % S].
# ---------------------------------------------------------------------------
_ROLL_MATCHES_JNP = None


def _ensure_roll_convention():
    global _ROLL_MATCHES_JNP
    if _ROLL_MATCHES_JNP is not None:
        return

    def probe(x_ref, o_ref):
        o_ref[...] = pltpu.roll(x_ref[...], 1, axis=1)

    x = jax.lax.broadcasted_iota(jnp.float32, (8, 128), 1)
    out = pl.pallas_call(
        probe, out_shape=jax.ShapeDtypeStruct((8, 128), jnp.float32))(x)
    # jnp.roll convention: roll(x, 1)[..., 0] == x[..., -1] == 127
    _ROLL_MATCHES_JNP = bool(out[0, 0] == 127.0)


def _roll_amount(offset, size):
    """pltpu.roll amount such that rolled[..., i] == x[..., (i + offset) % size]."""
    return (-offset) % size if _ROLL_MATCHES_JNP else offset % size


# ---------------------------------------------------------------------------
# Kernel 1: branch convolutions, grid = (N, NB).  One branch per grid step.
# ---------------------------------------------------------------------------
def _make_branch_conv_kernel(branch_taps, D, H, W, S, Co):
    HW = H * W

    def kernel(x_ref, w_ref, b_ref, y_ref, s_ref):
        x = x_ref[0]                                          # (Ci, S) bf16, resident across b
        pos = jax.lax.broadcasted_iota(jnp.int32, (1, S), 1)
        idx = (pos // HW, (pos // W) % H, pos % W)
        lim = (D, H, W)
        ones_row = jnp.ones((1, S), DOT_DTYPE)                # for MXU stat sums

        for b, taps in enumerate(branch_taps):
            @pl.when(pl.program_id(1) == b)
            def _branch(taps=taps):
                mask_cache = {}

                def axis_mask(ax, shift):
                    key = (ax, shift)
                    if key not in mask_cache:
                        mask_cache[key] = (idx[ax] + shift >= 0) & (idx[ax] + shift < lim[ax])
                    return mask_cache[key]

                acc = None
                for t, (sd, sh, sw) in enumerate(taps):
                    off = sd * HW + sh * W + sw               # flattened tap shift
                    xs = x if off == 0 else pltpu.roll(x, _roll_amount(off, S), axis=1)
                    contrib = jnp.dot(w_ref[0, t], xs,
                                      preferred_element_type=jnp.float32)   # (Co, S)
                    mask = None
                    for ax, sft in ((0, sd), (1, sh), (2, sw)):
                        if sft != 0:
                            am = axis_mask(ax, sft)
                            mask = am if mask is None else (mask & am)
                    if mask is not None:
                        # mask is spatially constant over the Ci contraction, so masking
                        # the (Co,S) result is exact and cheaper than masking the operand.
                        contrib = jnp.where(mask, contrib, 0.0)
                    acc = contrib if acc is None else acc + contrib

                out = acc + b_ref[0]                          # (Co, S) f32
                y_ref[0, 0] = out.astype(y_ref.dtype)
                # BN batch stats on the MXU (lane-dense (1, Co) results); K1's XLU is
                # already carrying the rolls, so keep it off the reduction path.
                s1 = jax.lax.dot_general(
                    ones_row, out.astype(DOT_DTYPE),
                    (((1,), (1,)), ((), ())), preferred_element_type=jnp.float32)
                s2 = jax.lax.dot_general(
                    ones_row, (out * out).astype(DOT_DTYPE),
                    (((1,), (1,)), ((), ())), preferred_element_type=jnp.float32)
                s_ref[0, 0, 0:1, :] = s1
                s_ref[0, 0, 1:2, :] = s2

    return kernel


def fused_branch_conv(x_cs, w_all, b_all, branch_taps, D, H, W, Co):
    N, Ci, S = x_cs.shape
    nb, tmax = w_all.shape[0], w_all.shape[1]
    kernel = _make_branch_conv_kernel(branch_taps, D, H, W, S, Co)
    return pl.pallas_call(
        kernel,
        out_shape=(jax.ShapeDtypeStruct((N, nb, Co, S), DOT_DTYPE),     # conv out (bf16)
                   jax.ShapeDtypeStruct((N, nb, 2, Co), jnp.float32)),  # [sum; sumsq]
        grid_spec=pltpu.PrefetchScalarGridSpec(
            num_scalar_prefetch=0,
            grid=(N, nb),
            in_specs=[pl.BlockSpec((1, Ci, S), lambda n, b: (n, 0, 0)),
                      pl.BlockSpec((1, tmax, Co, Ci), lambda n, b: (b, 0, 0, 0)),
                      pl.BlockSpec((1, Co, 1), lambda n, b: (b, 0, 0))],
            out_specs=[pl.BlockSpec((1, 1, Co, S), lambda n, b: (n, b, 0, 0)),
                       pl.BlockSpec((1, 1, 2, Co), lambda n, b: (n, b, 0, 0))]),
        compiler_params=pltpu.CompilerParams(
            dimension_semantics=("parallel", "parallel"),
            vmem_limit_bytes=VMEM_LIMIT_BYTES),
    )(x_cs, w_all, b_all)


# ---------------------------------------------------------------------------
# Kernel 2: per-branch BN affine + ReLU + final 1x1 conv (K = 7*Co matmul),
# S-tiled; final-BN stats accumulated in VMEM scratch across the S axis.
# ---------------------------------------------------------------------------
def _fused_bn_final_conv_kernel(y_ref, a_ref, c_ref, wf_ref, bf_ref,
                                z_ref, s_ref, s1_acc, s2_acc):
    si = pl.program_id(1)

    @pl.when(si == 0)
    def _():
        s1_acc[...] = jnp.zeros_like(s1_acc)
        s2_acc[...] = jnp.zeros_like(s2_acc)

    yn = jnp.maximum(y_ref[0].astype(jnp.float32) * a_ref[...] + c_ref[...], 0.0)
    z = jnp.dot(wf_ref[...], yn.astype(DOT_DTYPE),
                preferred_element_type=jnp.float32) + bf_ref[...]       # (Co, TILE_S)
    z_ref[0] = z.astype(z_ref.dtype)
    # No rolls in this kernel -> the XLU is idle, so lane reductions are free filler.
    s1_acc[...] += jnp.sum(z, axis=1, keepdims=True)
    s2_acc[...] += jnp.sum(z * z, axis=1, keepdims=True)

    @pl.when(si == pl.num_programs(1) - 1)
    def _():
        s_ref[0, :, 0:1] = s1_acc[...]
        s_ref[0, :, 1:2] = s2_acc[...]


def fused_bn_relu_final_conv(y, a, c, wf, bf, tile_s):
    N, C7, S = y.shape
    Co = wf.shape[0]
    nst = S // tile_s
    return pl.pallas_call(
        _fused_bn_final_conv_kernel,
        out_shape=(jax.ShapeDtypeStruct((N, Co, S), DOT_DTYPE),         # z (bf16)
                   jax.ShapeDtypeStruct((N, Co, 2), jnp.float32)),      # [sum, sumsq]
        grid_spec=pltpu.PrefetchScalarGridSpec(
            num_scalar_prefetch=0,
            grid=(N, nst),
            in_specs=[pl.BlockSpec((1, C7, tile_s), lambda n, s: (n, 0, s)),
                      pl.BlockSpec((C7, 1), lambda n, s: (0, 0)),
                      pl.BlockSpec((C7, 1), lambda n, s: (0, 0)),
                      pl.BlockSpec((Co, C7), lambda n, s: (0, 0)),
                      pl.BlockSpec((Co, 1), lambda n, s: (0, 0))],
            out_specs=[pl.BlockSpec((1, Co, tile_s), lambda n, s: (n, 0, s)),
                       pl.BlockSpec((1, Co, 2), lambda n, s: (n, 0, 0))],
            scratch_shapes=[pltpu.VMEM((Co, 1), jnp.float32),
                            pltpu.VMEM((Co, 1), jnp.float32)]),
        compiler_params=pltpu.CompilerParams(
            dimension_semantics=("parallel", "arbitrary"),
            vmem_limit_bytes=VMEM_LIMIT_BYTES),
    )(y, a, c, wf, bf)


# ---------------------------------------------------------------------------
# Kernel 3: final BatchNorm affine + ReLU, S-tiled.  bf16 z in, f32 module
# output out (dtypes differ, so no input/output aliasing here).
# ---------------------------------------------------------------------------
def _bn_relu_kernel(z_ref, a_ref, c_ref, o_ref):
    o_ref[0] = jnp.maximum(z_ref[0].astype(jnp.float32) * a_ref[...] + c_ref[...], 0.0)


def bn_relu_final(z, a, c, tile_s):
    N, Co, S = z.shape
    return pl.pallas_call(
        _bn_relu_kernel,
        out_shape=jax.ShapeDtypeStruct((N, Co, S), jnp.float32),
        grid_spec=pltpu.PrefetchScalarGridSpec(
            num_scalar_prefetch=0,
            grid=(N, S // tile_s),
            in_specs=[pl.BlockSpec((1, Co, tile_s), lambda n, s: (n, 0, s)),
                      pl.BlockSpec((Co, 1), lambda n, s: (0, 0)),
                      pl.BlockSpec((Co, 1), lambda n, s: (0, 0))],
            out_specs=pl.BlockSpec((1, Co, tile_s), lambda n, s: (n, 0, s))),
        compiler_params=pltpu.CompilerParams(
            dimension_semantics=("parallel", "parallel"),
            vmem_limit_bytes=VMEM_LIMIT_BYTES),
    )(z, a, c)


# ---------------------------------------------------------------------------
# Glue: tile choice, BN affine from kernel-emitted stats, params, forward.
# ---------------------------------------------------------------------------
def _pick_tile(S):
    # Cap at 1024 lanes (keeps K2's double-buffered tiles comfortably inside
    # v7x VMEM with bf16 y) while still giving >= 2 grid steps when possible.
    for cand in (1024, 512, 256, 128):
        if S % cand == 0 and S // cand >= 2:
            return cand
    return S


def _bn_affine(total_sum, total_sumsq, gamma, beta, count):
    # NOTE: E[x^2]-E[x]^2 in f32 can cancel for very large N*S; switch to a
    # two-pass / Welford combine if spatial sizes grow far beyond this scale.
    mean = total_sum / count
    var = jnp.maximum(total_sumsq / count - mean * mean, 0.0)   # biased (train-mode)
    a = gamma / jnp.sqrt(var + EPS)
    c = beta - mean * a
    return a, c


def init_params(key, ci, co):
    keys = jax.random.split(key, 4 * NB + 4)
    params = {"branches": []}
    idx = 0
    for cfg in BRANCHES:
        k = cfg["k"]
        kw_, kb, kg, kbt = keys[idx], keys[idx + 1], keys[idx + 2], keys[idx + 3]
        idx += 4
        params["branches"].append(dict(
            w=0.2 * jax.random.normal(kw_, (co, ci, k, k, k), jnp.float32),
            b=0.1 * jax.random.normal(kb, (co,), jnp.float32),
            gamma=1.0 + 0.1 * jax.random.normal(kg, (co,), jnp.float32),
            beta=0.1 * jax.random.normal(kbt, (co,), jnp.float32),
        ))
    kw_, kb, kg, kbt = keys[-4], keys[-3], keys[-2], keys[-1]
    params["final"] = dict(
        w=0.2 * jax.random.normal(kw_, (co, NB * co, 1, 1, 1), jnp.float32),
        b=0.1 * jax.random.normal(kb, (co,), jnp.float32),
        gamma=1.0 + 0.1 * jax.random.normal(kg, (co,), jnp.float32),
        beta=0.1 * jax.random.normal(kbt, (co,), jnp.float32),
    )
    return params


def assp_forward(x_ncdhw, params):
    _ensure_roll_convention()
    N, Ci, D, H, W = x_ncdhw.shape
    S = D * H * W
    Co = params["final"]["gamma"].shape[0]
    count = N * S
    tile_s = _pick_tile(S)

    # bf16 once: halves x's HBM DMA / VMEM residency and every roll's vreg traffic.
    x_cs = x_ncdhw.reshape(N, Ci, S).astype(DOT_DTYPE)

    # Per-branch tap lists + padded per-branch weight blocks (taps whose offset
    # exceeds the volume only ever read zero padding -> dropped).
    branch_taps, w_blocks = [], []
    for cfg, p in zip(BRANCHES, params["branches"]):
        k, dil, pad = cfg["k"], cfg["dil"], cfg["pad"]
        offs = [kk * dil - pad for kk in range(k)]
        taps_b, w_b = [], []
        for kd in range(k):
            for kh in range(k):
                for kw in range(k):
                    sd, sh, sw = offs[kd], offs[kh], offs[kw]
                    if abs(sd) >= D or abs(sh) >= H or abs(sw) >= W:
                        continue
                    taps_b.append((sd, sh, sw))
                    w_b.append(p["w"][:, :, kd, kh, kw])          # (Co, Ci)
        branch_taps.append(tuple(taps_b))
        w_blocks.append(jnp.stack(w_b, axis=0))                   # (Tb, Co, Ci)
    tmax = max(wb.shape[0] for wb in w_blocks)
    w_all = jnp.stack(
        [jnp.pad(wb, ((0, tmax - wb.shape[0]), (0, 0), (0, 0))) for wb in w_blocks],
        axis=0).astype(DOT_DTYPE)                                 # (NB, Tmax, Co, Ci)
    b_all = jnp.stack([p["b"].reshape(Co, 1) for p in params["branches"]], axis=0)

    y, bstats = fused_branch_conv(x_cs, w_all, b_all, tuple(branch_taps), D, H, W, Co)
    # y: (N, NB, Co, S) bf16;  bstats: (N, NB, 2, Co) f32

    gamma_all = jnp.stack([p["gamma"] for p in params["branches"]], axis=0)   # (NB, Co)
    beta_all = jnp.stack([p["beta"] for p in params["branches"]], axis=0)
    tot = jnp.sum(bstats, axis=0)                                  # (NB, 2, Co)
    a_b, c_b = _bn_affine(tot[:, 0, :], tot[:, 1, :], gamma_all, beta_all, count)
    a_all = a_b.reshape(NB * Co, 1)
    c_all = c_b.reshape(NB * Co, 1)

    pf = params["final"]
    wf = pf["w"][:, :, 0, 0, 0].astype(DOT_DTYPE)                  # (Co, 7*Co) bf16
    bf = pf["b"].reshape(Co, 1)
    y_cat = y.reshape(N, NB * Co, S)                               # free dim-merge reshape
    z, zstats = fused_bn_relu_final_conv(y_cat, a_all, c_all, wf, bf, tile_s)

    ztot = jnp.sum(zstats, axis=0)                                 # (Co, 2)
    af, cf = _bn_affine(ztot[:, 0], ztot[:, 1], pf["gamma"], pf["beta"], count)
    out = bn_relu_final(z, af.reshape(Co, 1), cf.reshape(Co, 1), tile_s)   # (N, Co, S) f32
    return out.reshape(N, Co, D, H, W)


# ---------------------------------------------------------------------------
# Pure-JAX reference of the PyTorch forward (training-mode BN), for validation.
# ---------------------------------------------------------------------------
def _ref_conv_bn_relu(x, p, dil, pad):
    y = jax.lax.conv_general_dilated(
        x, p["w"], window_strides=(1, 1, 1), padding=[(pad, pad)] * 3,
        rhs_dilation=(dil, dil, dil),
        dimension_numbers=("NCDHW", "OIDHW", "NCDHW"),
        precision=jax.lax.Precision.HIGHEST)
    y = y + p["b"].reshape(1, -1, 1, 1, 1)
    mean = jnp.mean(y, axis=(0, 2, 3, 4), keepdims=True)
    var = jnp.var(y, axis=(0, 2, 3, 4), keepdims=True)
    yn = (y - mean) / jnp.sqrt(var + EPS)
    yn = yn * p["gamma"].reshape(1, -1, 1, 1, 1) + p["beta"].reshape(1, -1, 1, 1, 1)
    return jnp.maximum(yn, 0.0)                      # LeakyReLU(0) == ReLU


def assp_reference(x, params):
    outs = [_ref_conv_bn_relu(x, p, cfg["dil"], cfg["pad"])
            for cfg, p in zip(BRANCHES, params["branches"])]
    cat = jnp.concatenate(outs, axis=1)
    return _ref_conv_bn_relu(cat, params["final"], 1, 0)


if __name__ == "__main__":
    key = jax.random.PRNGKey(0)
    kx, kp = jax.random.split(key)
    N, Ci, Co, D, H, W = 2, 4, 8, 8, 8, 8
    x = jax.random.normal(kx, (N, Ci, D, H, W), jnp.float32)
    params = init_params(kp, Ci, Co)

    out = jax.block_until_ready(assp_forward(x, params))
    assert out.shape == (N, Co, D, H, W), out.shape

    ref = jax.block_until_ready(assp_reference(x, params))
    max_err = float(jnp.max(jnp.abs(out - ref)))
    assert bool(jnp.allclose(out, ref, atol=1.5e-1, rtol=1e-1)), max_err

    print("KERNEL_OK")
</pallas_src>

<mosaic_0001>
module attributes {stable_mosaic.version = 11 : i64} {
  func.func @probe(%arg0: memref<8x128xf32, #tpu.memory_space<vmem>>, %arg1: memref<8x128xf32, #tpu.memory_space<vmem>>) attributes {dimension_semantics = [], scalar_prefetch = 0 : i64, scratch_operands = 0 : i64, tpu.core_type = #tpu.core_type<tc>} {
    %c0 = arith.constant 0 : index
    %c0_0 = arith.constant 0 : index
    %0 = vector.load %arg0[%c0, %c0_0] : memref<8x128xf32, #tpu.memory_space<vmem>>, vector<8x128xf32>
    %c1_i32 = arith.constant 1 : i32
    %1 = tpu.dynamic_rotate %0 by %c1_i32 dim 1 : vector<8x128xf32>, i32 -> vector<8x128xf32>
    %c0_1 = arith.constant 0 : index
    %c0_2 = arith.constant 0 : index
    %2 = vector.load %arg1[%c0_1, %c0_2] : memref<8x128xf32, #tpu.memory_space<vmem>>, vector<8x128xf32>
    tpu.vector_store %arg1[%c0_1, %c0_2], %1 {strides = array<i32>} : memref<8x128xf32, #tpu.memory_space<vmem>>, vector<8x128xf32>,
    return
  }
}

</mosaic_0001>

<bundles_post_ra>
// kernel: tpu_custom_call.1
= control target key start
LH: loop header
LB: loop body
LE: loop exit
PB: predicated region body
PF: predicated region fallthrough
CT: control target
= control target key end

     0   :  { %6 = vsyncpa [#allocation3], 0  ;;  %s128_s0 = inlined_call_operand.hbm [shape: f32[8,128], index: 0, kind: input, shape index: {}]   ;;  %s129_s1 = inlined_call_operand.hbm [shape: f32[8,128], index: 1, kind: output, shape index: {}]  }
   0x1   :  { %7 = vsyncpa [#allocation4], 0  ;;  %s91_s6 = smov [#allocation2]   ;;  %s43_s10 = scalar_lea.hbm %s128_s0, 128 }
   0x2   :  { %s14_s7 = sshll.u32 %s91_s6, 4  ;;  %p44_p0 = scmp.ne.s32.totalorder %s128_s0, %s43_s10  ;;  %s15_s7 = int_to_ptr.vmem [resolvable:$true] %s14_s7 }
   0x3   :  { %p47_p1 = scmp.lt.u32.totalorder %s43_s10, %s128_s0 }
   0x5   :  { %p49_p2 = pnand %p47_p1, %p44_p0 }
   0x7   :  { %52 = shalt.err (!%p49_p2)
}
   0x8   :  { %s53_s15 = scalar_lea.vmem %s15_s7, 128  ;;  %p58_p4 = scmp.lt.s32.totalorder %s15_s7, %s15_s7 }
   0x9   :  { %p54_p3 = scmp.ne.s32.totalorder %s15_s7, %s53_s15  ;;  %p59_p5 = scmp.lt.s32.totalorder %s53_s15, %s53_s15 }
   0xb   :  { %p60_p6 = por %p59_p5, %p58_p4 }
   0xd   :  { %p61_p7 = pnand %p60_p6, %p54_p3 }
   0xf   :  { %64 = shalt.err (!%p61_p7)
}
  0x10   :  { %17 = dma.hbm_to_vmem [thread:$0]  %s128_s0, 128, %s15_s7, [#allocation3]  }
  0x11   :  { %87 = dma.done.wait [#allocation3], 128  }
  0x12   :  { %88 = vsyncadd [#allocation3], 4294967168  ;;  %v21_v0 = vld [vmem:[#allocation2] sm:$0xff]  ;;  %s92_s18 = smov 1   ;;  %s93_s19 = smov [#allocation5]  }
  0x13   :  { %22 = vrot.lane.b32.xlu0 %v21_v0, %s92_s18  ;;  %s31_s20 = sshll.u32 %s93_s19, 4  ;;  %s32_s20 = int_to_ptr.vmem [resolvable:$true] %s31_s20 }
  0x14   :  { %s65_s21 = scalar_lea.vmem %s32_s20, 128  ;;  %p70_p9 = scmp.lt.s32.totalorder %s32_s20, %s32_s20 }
  0x15   :  { %p66_p8 = scmp.ne.s32.totalorder %s32_s20, %s65_s21  ;;  %p71_p10 = scmp.lt.s32.totalorder %s65_s21, %s65_s21 }
  0x17   :  { %p72_p11 = por %p71_p10, %p70_p9 }
  0x19   :  { %p73_p12 = pnand %p72_p11, %p66_p8 }
  0x85   :  { %v23_v1 = vpop.permute.xlu0 %22 }
  0x86   :  { %24 = vst [vmem:[#allocation5] sm:$0xff] %v23_v1 }
  0x87   :  { %76 = shalt.err (!%p73_p12)
}
  0x88   :  { %s77_s0 = scalar_lea.hbm %s129_s1, 128 }
  0x89   :  { %p78_p13 = scmp.ne.s32.totalorder %s129_s1, %s77_s0  ;;  %p81_p0 = scmp.lt.u32.totalorder %s77_s0, %s129_s1 }
  0x8b   :  { %p83_p1 = pnand %p81_p0, %p78_p13 }
  0x8d   :  { %86 = shalt.err (!%p83_p1)
}
  0x8e   :  { %34 = dma.vmem_to_hbm [thread:$0]  %s32_s20, 128, %s129_s1, [#allocation4]  }
  0x8f   :  { %89 = dma.done.wait [#allocation4], 128  }
  0x90   :  { %90 = vsyncadd [#allocation4], 4294967168 }
  0x91   :  { %38 = vsyncpa [#allocation3], 1 }
  0x92   :  { %39 = vsyncpa [#allocation4], 1 }

</bundles_post_ra>
